<compile_context>
chip_gen: v7x
topology: tpu7x:2x2x1
jax: 0.10.0
libtpu: 0.0.40
codegen_flags: <defaults>
</compile_context>

<pallas_src>
import functools

import jax
import jax.numpy as jnp
from jax.experimental import pallas as pl
from jax.experimental.pallas import tpu as pltpu

LEAKY_SLOPE = 0.2
BN_EPS = 1e-5
VMEM_LIMIT_BYTES = 32 * 1024 * 1024   # safe on v5e/v6e (128 MiB) and v7x (64 MiB/TC)
FUSE_MAX_ROWS = 1024                  # whole batch in one tile -> fused kernel
MAX_TILE_ROWS = 2048                  # tiled-path batch tile cap (v7x-safe)


def _round_up(x, m):
    return ((x + m - 1) // m) * m


def _cdiv(a, b):
    return (a + b - 1) // b


# ----------------------------------------------------------------------------
# Fused single-kernel path: entire forward in one pallas_call (B <= one tile).
# Full-batch BN statistics are tile-local since there is only one batch tile.
# ----------------------------------------------------------------------------
def _fused_kernel(z_ref, w0_ref, w1_ref, w2_ref, w3_ref, b3_ref,
                  g0_ref, be0_ref, g1_ref, be1_ref, g2_ref, be2_ref,
                  o_ref, *, block_b, n_valid, masked):
    ws = (w0_ref, w1_ref, w2_ref)
    gs = (g0_ref, g1_ref, g2_ref)
    bes = (be0_ref, be1_ref, be2_ref)

    h = z_ref[...]                                   # (block_b, lat_pad) f32
    if masked:
        row = jax.lax.broadcasted_iota(jnp.int32, (block_b, 1), 0)
        valid = row < n_valid
    inv_n = jnp.float32(1.0 / n_valid)

    for l in range(3):
        h = jnp.dot(h.astype(jnp.bfloat16), ws[l][...],
                    preferred_element_type=jnp.float32)      # bias absorbed by BN
        hm = jnp.where(valid, h, 0.0) if masked else h
        mean = jnp.sum(hm, axis=0, keepdims=True) * inv_n
        var = jnp.maximum(jnp.sum(hm * hm, axis=0, keepdims=True) * inv_n
                          - mean * mean, 0.0)
        rstd = jax.lax.rsqrt(var + BN_EPS)
        scale = gs[l][...] * rstd
        shift = bes[l][...] - mean * scale
        h = h * scale + shift
        h = jnp.where(h >= 0, h, LEAKY_SLOPE * h)

    h = jnp.dot(h.astype(jnp.bfloat16), w3_ref[...],
                preferred_element_type=jnp.float32) + b3_ref[...]
    o_ref[...] = jax.nn.sigmoid(h)


def _fused_call(zp, params, *, n_valid):
    b_pad, lat_pad = zp.shape
    out_pad = params["w"][3].shape[1]
    masked = (b_pad != n_valid)

    kernel = functools.partial(_fused_kernel, block_b=b_pad, n_valid=n_valid,
                               masked=masked)

    args = [zp]
    in_specs = [pl.BlockSpec((b_pad, lat_pad), lambda i: (0, 0))]
    for w in params["w"]:
        args.append(w)
        in_specs.append(pl.BlockSpec(w.shape, lambda i: (0, 0)))
    args.append(params["b"][3])
    in_specs.append(pl.BlockSpec(params["b"][3].shape, lambda i: (0, 0)))
    for l in range(3):
        args += [params["gamma"][l], params["beta"][l]]
        in_specs += [pl.BlockSpec(params["gamma"][l].shape, lambda i: (0, 0)),
                     pl.BlockSpec(params["beta"][l].shape, lambda i: (0, 0))]

    return pl.pallas_call(
        kernel,
        grid=(1,),
        in_specs=in_specs,
        out_specs=pl.BlockSpec((b_pad, out_pad), lambda i: (0, 0)),
        out_shape=jax.ShapeDtypeStruct((b_pad, out_pad), jnp.float32),
        compiler_params=pltpu.CompilerParams(
            dimension_semantics=("arbitrary",),
            vmem_limit_bytes=VMEM_LIMIT_BYTES,
        ),
    )(*args)


# ----------------------------------------------------------------------------
# Tiled path (large B): one pallas_call per Linear layer, gridded over batch
# tiles. Previous layer's BN (full-batch stats) + LeakyReLU is fused into the
# consuming kernel; inter-layer activations stored in bf16.
# ----------------------------------------------------------------------------
def _layer_kernel(*refs, block_b, n_valid, num_tiles, masked, fuse_bn, last):
    it = iter(refs)
    x_ref = next(it)
    if fuse_bn:
        ssum_ref = next(it)         # (num_tiles, 1, in_dim) f32, VMEM-resident
        ssq_ref = next(it)
        g_ref = next(it)            # (1, in_dim) f32
        be_ref = next(it)
    w_ref = next(it)                # (in_dim, out_dim) bf16, VMEM-resident
    b_ref = next(it) if last else None

    if fuse_bn:
        xf = x_ref[...].astype(jnp.float32)
        # In-kernel BN finalize: reduce per-tile partial sums (cheap, hidden
        # under the matmul), fold mean/var/gamma/beta into scale/shift.
        s = ssum_ref[0]
        sq = ssq_ref[0]
        for t in range(1, num_tiles):
            s = s + ssum_ref[t]
            sq = sq + ssq_ref[t]
        inv_n = jnp.float32(1.0 / n_valid)
        mean = s * inv_n
        var = jnp.maximum(sq * inv_n - mean * mean, 0.0)
        rstd = jax.lax.rsqrt(var + BN_EPS)
        scale = g_ref[...] * rstd
        shift = be_ref[...] - mean * scale
        a = xf * scale + shift
        a = jnp.where(a >= 0, a, LEAKY_SLOPE * a).astype(jnp.bfloat16)
    else:
        a = x_ref[...].astype(jnp.bfloat16)

    # bf16 operands, f32 accumulation on the MXU.
    h = jnp.dot(a, w_ref[...], preferred_element_type=jnp.float32)

    if last:
        o_ref = next(it)
        o_ref[...] = jax.nn.sigmoid(h + b_ref[...])
        return

    h_ref = next(it)
    ssum_out = next(it)
    ssq_out = next(it)

    hb = h.astype(jnp.bfloat16)
    h_ref[...] = hb                          # bf16 inter-layer activation

    # Partial BN statistics for THIS layer's output, computed from the
    # bf16-rounded values (exactly what the consumer will read), masking
    # padded batch rows so full-batch statistics stay exact under tiling.
    hs = hb.astype(jnp.float32)
    if masked:
        row = (pl.program_id(0) * block_b
               + jax.lax.broadcasted_iota(jnp.int32, (block_b, 1), 0))
        hs = jnp.where(row < n_valid, hs, 0.0)
    ssum_out[...] = jnp.sum(hs, axis=0, keepdims=True)[None]     # (1,1,out)
    ssq_out[...] = jnp.sum(hs * hs, axis=0, keepdims=True)[None]


def _layer_call(x, stats, params, l, *, block_b, n_valid, b_pad, last):
    w = params["w"][l]
    in_dim, out_dim = w.shape
    num_tiles = b_pad // block_b
    masked = (b_pad != n_valid)
    fuse_bn = stats is not None

    kernel = functools.partial(_layer_kernel, block_b=block_b, n_valid=n_valid,
                               num_tiles=num_tiles, masked=masked,
                               fuse_bn=fuse_bn, last=last)

    in_specs = [pl.BlockSpec((block_b, in_dim), lambda i: (i, 0))]
    args = [x]
    if fuse_bn:
        ssum, ssq, gamma, beta = stats
        in_specs += [
            pl.BlockSpec((num_tiles, 1, in_dim), lambda i: (0, 0, 0)),
            pl.BlockSpec((num_tiles, 1, in_dim), lambda i: (0, 0, 0)),
            pl.BlockSpec((1, in_dim), lambda i: (0, 0)),
            pl.BlockSpec((1, in_dim), lambda i: (0, 0)),
        ]
        args += [ssum, ssq, gamma, beta]
    in_specs.append(pl.BlockSpec((in_dim, out_dim), lambda i: (0, 0)))
    args.append(w)

    if last:
        in_specs.append(pl.BlockSpec((1, out_dim), lambda i: (0, 0)))
        args.append(params["b"][l])
        out_shape = jax.ShapeDtypeStruct((b_pad, out_dim), jnp.float32)
        out_specs = pl.BlockSpec((block_b, out_dim), lambda i: (i, 0))
    else:
        out_shape = (
            jax.ShapeDtypeStruct((b_pad, out_dim), jnp.bfloat16),
            jax.ShapeDtypeStruct((num_tiles, 1, out_dim), jnp.float32),
            jax.ShapeDtypeStruct((num_tiles, 1, out_dim), jnp.float32),
        )
        out_specs = (
            pl.BlockSpec((block_b, out_dim), lambda i: (i, 0)),
            pl.BlockSpec((1, 1, out_dim), lambda i: (i, 0, 0)),
            pl.BlockSpec((1, 1, out_dim), lambda i: (i, 0, 0)),
        )

    return pl.pallas_call(
        kernel,
        grid=(num_tiles,),
        in_specs=in_specs,
        out_specs=out_specs,
        out_shape=out_shape,
        compiler_params=pltpu.CompilerParams(
            dimension_semantics=("parallel",),
            vmem_limit_bytes=VMEM_LIMIT_BYTES,
        ),
    )(*args)


# ----------------------------------------------------------------------------
# Parameter setup (spectral norm applied here, plain JAX weight reparam).
# ----------------------------------------------------------------------------
def spectral_normalize(w, n_iters=30):
    """Divide weight (out, in) by its largest singular value (power iteration),
    matching torch.nn.utils.spectral_norm's forward-time effect."""
    out_dim, _ = w.shape
    u = jnp.ones((out_dim,), jnp.float32) / jnp.sqrt(out_dim)

    def body(_, u):
        v = w.T @ u
        v = v / (jnp.linalg.norm(v) + 1e-12)
        u = w @ v
        u = u / (jnp.linalg.norm(u) + 1e-12)
        return u

    u = jax.lax.fori_loop(0, n_iters, body, u)
    v = w.T @ u
    v = v / (jnp.linalg.norm(v) + 1e-12)
    sigma = u @ (w @ v)
    return w / sigma


def init_params(key, latent_dim, output_dim):
    feats = [latent_dim, 512, 128, 32, output_dim]
    fpad = [_round_up(f, 128) for f in feats]        # lane-dense (128-wide) dims

    Ws, Bs = [], []
    for l in range(4):
        fan_in, fan_out = feats[l], feats[l + 1]
        key, kw, kb = jax.random.split(key, 3)
        bound = fan_in ** -0.5
        w = jax.random.uniform(kw, (fan_out, fan_in), jnp.float32, -bound, bound)
        b = jax.random.uniform(kb, (fan_out,), jnp.float32, -bound, bound)
        w = spectral_normalize(w).T                  # (in, out), SN applied
        wp = jnp.zeros((fpad[l], fpad[l + 1]), jnp.float32)
        wp = wp.at[:fan_in, :fan_out].set(w)
        bp = jnp.zeros((1, fpad[l + 1]), jnp.float32).at[0, :fan_out].set(b)
        Ws.append(wp.astype(jnp.bfloat16))           # bf16 MXU operands
        Bs.append(bp)                                # f32 (hidden biases absorbed by BN)

    # BN affine params (PyTorch defaults gamma=1, beta=0); gamma padded lanes
    # are zero so padded features stay exactly zero through every layer.
    gammas = [jnp.zeros((1, fpad[l + 1]), jnp.float32).at[0, :feats[l + 1]].set(1.0)
              for l in range(3)]
    betas = [jnp.zeros((1, fpad[l + 1]), jnp.float32) for l in range(3)]
    return {"w": Ws, "b": Bs, "gamma": gammas, "beta": betas}


# ----------------------------------------------------------------------------
# Forward pass.
# ----------------------------------------------------------------------------
@functools.partial(jax.jit, static_argnames=("output_dim", "force_tiled"))
def generator_forward(z, params, output_dim, force_tiled=False):
    if z.ndim == 1:
        z = z[None, :]
    B = z.shape[0]
    lat_pad = params["w"][0].shape[0]
    z = z.astype(jnp.float32)

    if (not force_tiled) and B <= FUSE_MAX_ROWS:
        # Whole batch in one tile -> single fused kernel (4 matmuls + BN +
        # LeakyReLU + sigmoid), everything VMEM-resident.
        b_pad = _round_up(B, 8)
        zp = jnp.pad(z, ((0, b_pad - B), (0, lat_pad - z.shape[1])))
        out = _fused_call(zp, params, n_valid=B)
        return out[:B, :output_dim]

    # Tiled path: balanced tiles, >= 2 (feeds both v7x TensorCores), multiple
    # of 16 rows (bf16 sublane packing), capped at MAX_TILE_ROWS for v7x VMEM.
    num_tiles = max(2, _cdiv(B, MAX_TILE_ROWS))
    block_b = _round_up(_cdiv(B, num_tiles), 16)
    b_pad = block_b * num_tiles
    h = jnp.pad(z, ((0, b_pad - B), (0, lat_pad - z.shape[1])))

    stats = None
    for l in range(3):
        h, ssum, ssq = _layer_call(h, stats, params, l, block_b=block_b,
                                   n_valid=B, b_pad=b_pad, last=False)
        stats = (ssum, ssq, params["gamma"][l], params["beta"][l])
    out = _layer_call(h, stats, params, 3, block_b=block_b,
                      n_valid=B, b_pad=b_pad, last=True)
    return out[:B, :output_dim]


# ----------------------------------------------------------------------------
# References (plain JAX / XLA) for correctness checking.
# ----------------------------------------------------------------------------
def reference_forward(z, params, output_dim, *, matmul_bf16=True,
                      bf16_activations=False, apply_hidden_bias=False):
    if z.ndim == 1:
        z = z[None, :]
    lat_pad = params["w"][0].shape[0]
    h = jnp.pad(z.astype(jnp.float32), ((0, 0), (0, lat_pad - z.shape[1])))
    mm_dtype = jnp.bfloat16 if matmul_bf16 else jnp.float32
    n = h.shape[0]
    inv_n = jnp.float32(1.0 / n)
    for l in range(4):
        w = params["w"][l].astype(mm_dtype)
        h = jnp.dot(h.astype(mm_dtype), w, preferred_element_type=jnp.float32)
        if l == 3:
            h = h + params["b"][l]
        else:
            if apply_hidden_bias:
                h = h + params["b"][l]          # mathematically absorbed by BN
            if bf16_activations:
                h = h.astype(jnp.bfloat16).astype(jnp.float32)
            mean = jnp.sum(h, axis=0, keepdims=True) * inv_n
            var = jnp.maximum(jnp.sum(h * h, axis=0, keepdims=True) * inv_n
                              - mean * mean, 0.0)
            rstd = jax.lax.rsqrt(var + BN_EPS)
            scale = params["gamma"][l] * rstd
            shift = params["beta"][l] - mean * scale
            h = h * scale + shift
            h = jnp.where(h >= 0, h, LEAKY_SLOPE * h)
    return jax.nn.sigmoid(h)[:, :output_dim]


if __name__ == "__main__":
    latent_dim = 32
    output_dim = 16

    key = jax.random.PRNGKey(0)
    kp, kz, kz2 = jax.random.split(key, 3)
    params = init_params(kp, latent_dim, output_dim)

    # --- Fused single-kernel path (small batch) --------------------------------
    batch = 8
    z = jax.random.normal(kz, (batch, latent_dim), jnp.float32)
    out = jax.block_until_ready(generator_forward(z, params, output_dim))
    assert out.shape == (batch, output_dim)

    # Tight check vs an XLA reference with matching numerics (bf16 matmul
    # operands, f32 accumulation / BN, hidden biases absorbed by BN).
    ref = reference_forward(z, params, output_dim, matmul_bf16=True)
    assert jnp.allclose(out, ref, atol=2e-3, rtol=1e-2), \
        float(jnp.max(jnp.abs(out - ref)))

    # Loose check vs a full-f32, PyTorch-faithful reference (biases applied;
    # differences are bf16 operand rounding only).
    ref32 = reference_forward(z, params, output_dim, matmul_bf16=False,
                              apply_hidden_bias=True)
    assert jnp.allclose(out, ref32, atol=5e-2, rtol=5e-2), \
        float(jnp.max(jnp.abs(out - ref32)))

    # --- Tiled multi-kernel path (exercised at small shape via force_tiled) ----
    batch2 = 40
    z2 = jax.random.normal(kz2, (batch2, latent_dim), jnp.float32)
    out2 = jax.block_until_ready(
        generator_forward(z2, params, output_dim, force_tiled=True))
    assert out2.shape == (batch2, output_dim)
    ref2 = reference_forward(z2, params, output_dim, matmul_bf16=True,
                             bf16_activations=True)
    assert jnp.allclose(out2, ref2, atol=5e-3, rtol=1e-2), \
        float(jnp.max(jnp.abs(out2 - ref2)))
    ref2_32 = reference_forward(z2, params, output_dim, matmul_bf16=False,
                                apply_hidden_bias=True)
    assert jnp.allclose(out2, ref2_32, atol=5e-2, rtol=5e-2), \
        float(jnp.max(jnp.abs(out2 - ref2_32)))

    print("KERNEL_OK")
</pallas_src>

<mosaic_0001>
module attributes {stable_mosaic.version = 11 : i64} {
  func.func @_fused_kernel(%arg0: i32, %arg1: memref<8x128xf32, #tpu.memory_space<vmem>>, %arg2: memref<128x512xbf16, #tpu.memory_space<vmem>>, %arg3: memref<512x128xbf16, #tpu.memory_space<vmem>>, %arg4: memref<128x128xbf16, #tpu.memory_space<vmem>>, %arg5: memref<128x128xbf16, #tpu.memory_space<vmem>>, %arg6: memref<1x128xf32, #tpu.memory_space<vmem>>, %arg7: memref<1x512xf32, #tpu.memory_space<vmem>>, %arg8: memref<1x512xf32, #tpu.memory_space<vmem>>, %arg9: memref<1x128xf32, #tpu.memory_space<vmem>>, %arg10: memref<1x128xf32, #tpu.memory_space<vmem>>, %arg11: memref<1x128xf32, #tpu.memory_space<vmem>>, %arg12: memref<1x128xf32, #tpu.memory_space<vmem>>, %arg13: memref<8x128xf32, #tpu.memory_space<vmem>>) attributes {dimension_semantics = [#tpu.dimension_semantics<arbitrary>], iteration_bounds = array<i64: 1>, scalar_prefetch = 0 : i64, scratch_operands = 0 : i64, tpu.core_type = #tpu.core_type<tc>, window_params = [{pipeline_mode = #tpu.pipeline_mode<synchronous>, transform_indices = @transform_0, window_bounds = array<i64: 8, 128>}, {pipeline_mode = #tpu.pipeline_mode<synchronous>, transform_indices = @transform_1, window_bounds = array<i64: 128, 512>}, {pipeline_mode = #tpu.pipeline_mode<synchronous>, transform_indices = @transform_2, window_bounds = array<i64: 512, 128>}, {pipeline_mode = #tpu.pipeline_mode<synchronous>, transform_indices = @transform_3, window_bounds = array<i64: 128, 128>}, {pipeline_mode = #tpu.pipeline_mode<synchronous>, transform_indices = @transform_4, window_bounds = array<i64: 128, 128>}, {pipeline_mode = #tpu.pipeline_mode<synchronous>, transform_indices = @transform_5, window_bounds = array<i64: 1, 128>}, {pipeline_mode = #tpu.pipeline_mode<synchronous>, transform_indices = @transform_6, window_bounds = array<i64: 1, 512>}, {pipeline_mode = #tpu.pipeline_mode<synchronous>, transform_indices = @transform_7, window_bounds = array<i64: 1, 512>}, {pipeline_mode = #tpu.pipeline_mode<synchronous>, transform_indices = @transform_8, window_bounds = array<i64: 1, 128>}, {pipeline_mode = #tpu.pipeline_mode<synchronous>, transform_indices = @transform_9, window_bounds = array<i64: 1, 128>}, {pipeline_mode = #tpu.pipeline_mode<synchronous>, transform_indices = @transform_10, window_bounds = array<i64: 1, 128>}, {pipeline_mode = #tpu.pipeline_mode<synchronous>, transform_indices = @transform_11, window_bounds = array<i64: 1, 128>}, {pipeline_mode = #tpu.pipeline_mode<synchronous>, transform_indices = @transform_12, window_bounds = array<i64: 8, 128>}]} {
    %c0 = arith.constant 0 : index
    %c0_0 = arith.constant 0 : index
    %0 = vector.load %arg1[%c0, %c0_0] : memref<8x128xf32, #tpu.memory_space<vmem>>, vector<8x128xf32>
    %1 = arith.truncf %0 : vector<8x128xf32> to vector<8x128xbf16>
    %c0_1 = arith.constant 0 : index
    %c0_2 = arith.constant 0 : index
    %2 = vector.load %arg2[%c0_1, %c0_2] : memref<128x512xbf16, #tpu.memory_space<vmem>>, vector<128x512xbf16>
    %cst = arith.constant dense<0.000000e+00> : vector<8x512xf32>
    %3 = tpu.matmul %1, %2, %cst {dimension_numbers = #tpu.dot_dimension_numbers<[1], [0], [0], [1], [0, 0, 1, 1], [], []>} : vector<8x128xbf16>, vector<128x512xbf16>, vector<8x512xf32> -> vector<8x512xf32>
    %cst_3 = arith.constant dense<0.000000e+00> : vector<512xf32>
    %4 = vector.multi_reduction <add>, %3, %cst_3 [0] : vector<8x512xf32> to vector<512xf32>
    %5 = vector.shape_cast %4 : vector<512xf32> to vector<1x512xf32>
    %cst_4 = arith.constant 1.250000e-01 : f32
    %6 = vector.broadcast %cst_4 : f32 to vector<1x512xf32>
    %7 = arith.mulf %5, %6 : vector<1x512xf32>
    %8 = arith.mulf %3, %3 : vector<8x512xf32>
    %cst_5 = arith.constant dense<0.000000e+00> : vector<512xf32>
    %9 = vector.multi_reduction <add>, %8, %cst_5 [0] : vector<8x512xf32> to vector<512xf32>
    %10 = vector.shape_cast %9 : vector<512xf32> to vector<1x512xf32>
    %cst_6 = arith.constant 1.250000e-01 : f32
    %11 = vector.broadcast %cst_6 : f32 to vector<1x512xf32>
    %12 = arith.mulf %10, %11 : vector<1x512xf32>
    %13 = arith.mulf %7, %7 : vector<1x512xf32>
    %14 = arith.subf %12, %13 : vector<1x512xf32>
    %cst_7 = arith.constant 0.000000e+00 : f32
    %15 = vector.broadcast %cst_7 : f32 to vector<1x512xf32>
    %16 = arith.maximumf %14, %15 : vector<1x512xf32>
    %cst_8 = arith.constant 9.99999974E-6 : f32
    %17 = vector.broadcast %cst_8 : f32 to vector<1x512xf32>
    %18 = arith.addf %16, %17 : vector<1x512xf32>
    %19 = math.rsqrt %18 : vector<1x512xf32>
    %c0_9 = arith.constant 0 : index
    %c0_10 = arith.constant 0 : index
    %20 = vector.load %arg7[%c0_9, %c0_10] : memref<1x512xf32, #tpu.memory_space<vmem>>, vector<1x512xf32>
    %21 = arith.mulf %20, %19 : vector<1x512xf32>
    %c0_11 = arith.constant 0 : index
    %c0_12 = arith.constant 0 : index
    %22 = vector.load %arg8[%c0_11, %c0_12] : memref<1x512xf32, #tpu.memory_space<vmem>>, vector<1x512xf32>
    %23 = arith.mulf %7, %21 : vector<1x512xf32>
    %24 = arith.subf %22, %23 : vector<1x512xf32>
    %25 = vector.broadcast %21 : vector<1x512xf32> to vector<8x512xf32>
    %26 = arith.mulf %3, %25 : vector<8x512xf32>
    %27 = vector.broadcast %24 : vector<1x512xf32> to vector<8x512xf32>
    %28 = arith.addf %26, %27 : vector<8x512xf32>
    %cst_13 = arith.constant 0.000000e+00 : f32
    %29 = vector.broadcast %cst_13 : f32 to vector<8x512xf32>
    %30 = arith.cmpf oge, %28, %29 : vector<8x512xf32>
    %cst_14 = arith.constant 2.000000e-01 : f32
    %31 = vector.broadcast %cst_14 : f32 to vector<8x512xf32>
    %32 = arith.mulf %31, %28 : vector<8x512xf32>
    %33 = arith.select %30, %28, %32 : vector<8x512xi1>, vector<8x512xf32>
    %34 = arith.truncf %33 : vector<8x512xf32> to vector<8x512xbf16>
    %c0_15 = arith.constant 0 : index
    %c0_16 = arith.constant 0 : index
    %35 = vector.load %arg3[%c0_15, %c0_16] : memref<512x128xbf16, #tpu.memory_space<vmem>>, vector<512x128xbf16>
    %cst_17 = arith.constant dense<0.000000e+00> : vector<8x128xf32>
    %36 = tpu.matmul %34, %35, %cst_17 {dimension_numbers = #tpu.dot_dimension_numbers<[1], [0], [0], [1], [0, 0, 1, 1], [], []>} : vector<8x512xbf16>, vector<512x128xbf16>, vector<8x128xf32> -> vector<8x128xf32>
    %cst_18 = arith.constant dense<0.000000e+00> : vector<128xf32>
    %37 = vector.multi_reduction <add>, %36, %cst_18 [0] : vector<8x128xf32> to vector<128xf32>
    %38 = vector.shape_cast %37 : vector<128xf32> to vector<1x128xf32>
    %cst_19 = arith.constant 1.250000e-01 : f32
    %39 = vector.broadcast %cst_19 : f32 to vector<1x128xf32>
    %40 = arith.mulf %38, %39 : vector<1x128xf32>
    %41 = arith.mulf %36, %36 : vector<8x128xf32>
    %cst_20 = arith.constant dense<0.000000e+00> : vector<128xf32>
    %42 = vector.multi_reduction <add>, %41, %cst_20 [0] : vector<8x128xf32> to vector<128xf32>
    %43 = vector.shape_cast %42 : vector<128xf32> to vector<1x128xf32>
    %cst_21 = arith.constant 1.250000e-01 : f32
    %44 = vector.broadcast %cst_21 : f32 to vector<1x128xf32>
    %45 = arith.mulf %43, %44 : vector<1x128xf32>
    %46 = arith.mulf %40, %40 : vector<1x128xf32>
    %47 = arith.subf %45, %46 : vector<1x128xf32>
    %cst_22 = arith.constant 0.000000e+00 : f32
    %48 = vector.broadcast %cst_22 : f32 to vector<1x128xf32>
    %49 = arith.maximumf %47, %48 : vector<1x128xf32>
    %cst_23 = arith.constant 9.99999974E-6 : f32
    %50 = vector.broadcast %cst_23 : f32 to vector<1x128xf32>
    %51 = arith.addf %49, %50 : vector<1x128xf32>
    %52 = math.rsqrt %51 : vector<1x128xf32>
    %c0_24 = arith.constant 0 : index
    %c0_25 = arith.constant 0 : index
    %53 = vector.load %arg9[%c0_24, %c0_25] : memref<1x128xf32, #tpu.memory_space<vmem>>, vector<1x128xf32>
    %54 = arith.mulf %53, %52 : vector<1x128xf32>
    %c0_26 = arith.constant 0 : index
    %c0_27 = arith.constant 0 : index
    %55 = vector.load %arg10[%c0_26, %c0_27] : memref<1x128xf32, #tpu.memory_space<vmem>>, vector<1x128xf32>
    %56 = arith.mulf %40, %54 : vector<1x128xf32>
    %57 = arith.subf %55, %56 : vector<1x128xf32>
    %58 = vector.broadcast %54 : vector<1x128xf32> to vector<8x128xf32>
    %59 = arith.mulf %36, %58 : vector<8x128xf32>
    %60 = vector.broadcast %57 : vector<1x128xf32> to vector<8x128xf32>
    %61 = arith.addf %59, %60 : vector<8x128xf32>
    %cst_28 = arith.constant 0.000000e+00 : f32
    %62 = vector.broadcast %cst_28 : f32 to vector<8x128xf32>
    %63 = arith.cmpf oge, %61, %62 : vector<8x128xf32>
    %cst_29 = arith.constant 2.000000e-01 : f32
    %64 = vector.broadcast %cst_29 : f32 to vector<8x128xf32>
    %65 = arith.mulf %64, %61 : vector<8x128xf32>
    %66 = arith.select %63, %61, %65 : vector<8x128xi1>, vector<8x128xf32>
    %67 = arith.truncf %66 : vector<8x128xf32> to vector<8x128xbf16>
    %c0_30 = arith.constant 0 : index
    %c0_31 = arith.constant 0 : index
    %68 = vector.load %arg4[%c0_30, %c0_31] : memref<128x128xbf16, #tpu.memory_space<vmem>>, vector<128x128xbf16>
    %cst_32 = arith.constant dense<0.000000e+00> : vector<8x128xf32>
    %69 = tpu.matmul %67, %68, %cst_32 {dimension_numbers = #tpu.dot_dimension_numbers<[1], [0], [0], [1], [0, 0, 1, 1], [], []>} : vector<8x128xbf16>, vector<128x128xbf16>, vector<8x128xf32> -> vector<8x128xf32>
    %cst_33 = arith.constant dense<0.000000e+00> : vector<128xf32>
    %70 = vector.multi_reduction <add>, %69, %cst_33 [0] : vector<8x128xf32> to vector<128xf32>
    %71 = vector.shape_cast %70 : vector<128xf32> to vector<1x128xf32>
    %cst_34 = arith.constant 1.250000e-01 : f32
    %72 = vector.broadcast %cst_34 : f32 to vector<1x128xf32>
    %73 = arith.mulf %71, %72 : vector<1x128xf32>
    %74 = arith.mulf %69, %69 : vector<8x128xf32>
    %cst_35 = arith.constant dense<0.000000e+00> : vector<128xf32>
    %75 = vector.multi_reduction <add>, %74, %cst_35 [0] : vector<8x128xf32> to vector<128xf32>
    %76 = vector.shape_cast %75 : vector<128xf32> to vector<1x128xf32>
    %cst_36 = arith.constant 1.250000e-01 : f32
    %77 = vector.broadcast %cst_36 : f32 to vector<1x128xf32>
    %78 = arith.mulf %76, %77 : vector<1x128xf32>
    %79 = arith.mulf %73, %73 : vector<1x128xf32>
    %80 = arith.subf %78, %79 : vector<1x128xf32>
    %cst_37 = arith.constant 0.000000e+00 : f32
    %81 = vector.broadcast %cst_37 : f32 to vector<1x128xf32>
    %82 = arith.maximumf %80, %81 : vector<1x128xf32>
    %cst_38 = arith.constant 9.99999974E-6 : f32
    %83 = vector.broadcast %cst_38 : f32 to vector<1x128xf32>
    %84 = arith.addf %82, %83 : vector<1x128xf32>
    %85 = math.rsqrt %84 : vector<1x128xf32>
    %c0_39 = arith.constant 0 : index
    %c0_40 = arith.constant 0 : index
    %86 = vector.load %arg11[%c0_39, %c0_40] : memref<1x128xf32, #tpu.memory_space<vmem>>, vector<1x128xf32>
    %87 = arith.mulf %86, %85 : vector<1x128xf32>
    %c0_41 = arith.constant 0 : index
    %c0_42 = arith.constant 0 : index
    %88 = vector.load %arg12[%c0_41, %c0_42] : memref<1x128xf32, #tpu.memory_space<vmem>>, vector<1x128xf32>
    %89 = arith.mulf %73, %87 : vector<1x128xf32>
    %90 = arith.subf %88, %89 : vector<1x128xf32>
    %91 = vector.broadcast %87 : vector<1x128xf32> to vector<8x128xf32>
    %92 = arith.mulf %69, %91 : vector<8x128xf32>
    %93 = vector.broadcast %90 : vector<1x128xf32> to vector<8x128xf32>
    %94 = arith.addf %92, %93 : vector<8x128xf32>
    %cst_43 = arith.constant 0.000000e+00 : f32
    %95 = vector.broadcast %cst_43 : f32 to vector<8x128xf32>
    %96 = arith.cmpf oge, %94, %95 : vector<8x128xf32>
    %cst_44 = arith.constant 2.000000e-01 : f32
    %97 = vector.broadcast %cst_44 : f32 to vector<8x128xf32>
    %98 = arith.mulf %97, %94 : vector<8x128xf32>
    %99 = arith.select %96, %94, %98 : vector<8x128xi1>, vector<8x128xf32>
    %100 = arith.truncf %99 : vector<8x128xf32> to vector<8x128xbf16>
    %c0_45 = arith.constant 0 : index
    %c0_46 = arith.constant 0 : index
    %101 = vector.load %arg5[%c0_45, %c0_46] : memref<128x128xbf16, #tpu.memory_space<vmem>>, vector<128x128xbf16>
    %cst_47 = arith.constant dense<0.000000e+00> : vector<8x128xf32>
    %102 = tpu.matmul %100, %101, %cst_47 {dimension_numbers = #tpu.dot_dimension_numbers<[1], [0], [0], [1], [0, 0, 1, 1], [], []>} : vector<8x128xbf16>, vector<128x128xbf16>, vector<8x128xf32> -> vector<8x128xf32>
    %c0_48 = arith.constant 0 : index
    %c0_49 = arith.constant 0 : index
    %103 = vector.load %arg6[%c0_48, %c0_49] : memref<1x128xf32, #tpu.memory_space<vmem>>, vector<1x128xf32>
    %104 = vector.broadcast %103 : vector<1x128xf32> to vector<8x128xf32>
    %105 = arith.addf %102, %104 : vector<8x128xf32>
    %106 = arith.negf %105 : vector<8x128xf32>
    %107 = math.exp %106 : vector<8x128xf32>
    %cst_50 = arith.constant 1.000000e+00 : f32
    %108 = vector.broadcast %cst_50 : f32 to vector<8x128xf32>
    %109 = arith.addf %108, %107 : vector<8x128xf32>
    %110 = arith.divf %108, %109 : vector<8x128xf32>
    %c0_51 = arith.constant 0 : index
    %c0_52 = arith.constant 0 : index
    %111 = vector.load %arg13[%c0_51, %c0_52] : memref<8x128xf32, #tpu.memory_space<vmem>>, vector<8x128xf32>
    tpu.vector_store %arg13[%c0_51, %c0_52], %110 {strides = array<i32>} : memref<8x128xf32, #tpu.memory_space<vmem>>, vector<8x128xf32>,
    return
  }
  func.func @transform_0(%arg0: i32) -> (i32, i32) {
    %c0_i32 = arith.constant 0 : i32
    %c0_i32_0 = arith.constant 0 : i32
    %c0_i32_1 = arith.constant 0 : i32
    return %c0_i32, %c0_i32_0 : i32, i32
  }
  func.func @transform_1(%arg0: i32) -> (i32, i32) {
    %c0_i32 = arith.constant 0 : i32
    %c0_i32_0 = arith.constant 0 : i32
    %c0_i32_1 = arith.constant 0 : i32
    return %c0_i32, %c0_i32_0 : i32, i32
  }
  func.func @transform_2(%arg0: i32) -> (i32, i32) {
    %c0_i32 = arith.constant 0 : i32
    %c0_i32_0 = arith.constant 0 : i32
    %c0_i32_1 = arith.constant 0 : i32
    return %c0_i32, %c0_i32_0 : i32, i32
  }
  func.func @transform_3(%arg0: i32) -> (i32, i32) {
    %c0_i32 = arith.constant 0 : i32
    %c0_i32_0 = arith.constant 0 : i32
    %c0_i32_1 = arith.constant 0 : i32
    return %c0_i32, %c0_i32_0 : i32, i32
  }
  func.func @transform_4(%arg0: i32) -> (i32, i32) {
    %c0_i32 = arith.constant 0 : i32
    %c0_i32_0 = arith.constant 0 : i32
    %c0_i32_1 = arith.constant 0 : i32
    return %c0_i32, %c0_i32_0 : i32, i32
  }
  func.func @transform_5(%arg0: i32) -> (i32, i32) {
    %c0_i32 = arith.constant 0 : i32
    %c0_i32_0 = arith.constant 0 : i32
    %c0_i32_1 = arith.constant 0 : i32
    return %c0_i32, %c0_i32_0 : i32, i32
  }
  func.func @transform_6(%arg0: i32) -> (i32, i32) {
    %c0_i32 = arith.constant 0 : i32
    %c0_i32_0 = arith.constant 0 : i32
    %c0_i32_1 = arith.constant 0 : i32
    return %c0_i32, %c0_i32_0 : i32, i32
  }
  func.func @transform_7(%arg0: i32) -> (i32, i32) {
    %c0_i32 = arith.constant 0 : i32
    %c0_i32_0 = arith.constant 0 : i32
    %c0_i32_1 = arith.constant 0 : i32
    return %c0_i32, %c0_i32_0 : i32, i32
  }
  func.func @transform_8(%arg0: i32) -> (i32, i32) {
    %c0_i32 = arith.constant 0 : i32
    %c0_i32_0 = arith.constant 0 : i32
    %c0_i32_1 = arith.constant 0 : i32
    return %c0_i32, %c0_i32_0 : i32, i32
  }
  func.func @transform_9(%arg0: i32) -> (i32, i32) {
    %c0_i32 = arith.constant 0 : i32
    %c0_i32_0 = arith.constant 0 : i32
    %c0_i32_1 = arith.constant 0 : i32
    return %c0_i32, %c0_i32_0 : i32, i32
  }
  func.func @transform_10(%arg0: i32) -> (i32, i32) {
    %c0_i32 = arith.constant 0 : i32
    %c0_i32_0 = arith.constant 0 : i32
    %c0_i32_1 = arith.constant 0 : i32
    return %c0_i32, %c0_i32_0 : i32, i32
  }
  func.func @transform_11(%arg0: i32) -> (i32, i32) {
    %c0_i32 = arith.constant 0 : i32
    %c0_i32_0 = arith.constant 0 : i32
    %c0_i32_1 = arith.constant 0 : i32
    return %c0_i32, %c0_i32_0 : i32, i32
  }
  func.func @transform_12(%arg0: i32) -> (i32, i32) {
    %c0_i32 = arith.constant 0 : i32
    %c0_i32_0 = arith.constant 0 : i32
    %c0_i32_1 = arith.constant 0 : i32
    return %c0_i32, %c0_i32_0 : i32, i32
  }
}

</mosaic_0001>

<bundles_post_ra>
// kernel: generator_forward.1
= control target key start
LH: loop header
LB: loop body
LE: loop exit
PB: predicated region body
PF: predicated region fallthrough
CT: control target
= control target key end

     0   :  { %17 = vsyncpa [#allocation3], 0  ;;  %s1906_s0 = inlined_call_operand.vmem [shape: f32[8,128], index: 0, kind: input, shape index: {}]   ;;  %s1907_s1 = inlined_call_operand.hbm [shape: bf16[128,512], index: 1, kind: input, shape index: {}]   ;;  %s1908_s2 = inlined_call_operand.hbm [shape: bf16[512,128], index: 2, kind: input, shape index: {}]   ;;  %s1909_s3 = inlined_call_operand.hbm [shape: bf16[128,128], index: 3, kind: input, shape index: {}]   ;;  %s1910_s4 = inlined_call_operand.hbm [shape: bf16[128,128], index: 4, kind: input, shape index: {}]   ;;  %s1911_s5 = inlined_call_operand.vmem [shape: f32[1,128], index: 5, kind: input, shape index: {}]   ;;  %s1912_s6 = inlined_call_operand.vmem [shape: f32[1,512], index: 6, kind: input, shape index: {}]   ;;  %s1913_s7 = inlined_call_operand.vmem [shape: f32[1,512], index: 7, kind: input, shape index: {}]   ;;  %s1914_s8 = inlined_call_operand.vmem [shape: f32[1,128], index: 8, kind: input, shape index: {}]   ;;  %s1915_s9 = inlined_call_operand.vmem [shape: f32[1,128], index: 9, kind: input, shape index: {}]   ;;  %s1916_s10 = inlined_call_operand.vmem [shape: f32[1,128], index: 10, kind: input, shape index: {}]   ;;  %s1917_s11 = inlined_call_operand.vmem [shape: f32[1,128], index: 11, kind: input, shape index: {}]   ;;  %s1918_s12 = inlined_call_operand.hbm [shape: f32[8,128], index: 12, kind: output, shape index: {}]  }
   0x1   :  { %18 = vsyncpa [#allocation6], 0 }
   0x2   :  { %19 = vsyncpa [#allocation9], 0 }
   0x3   :  { %20 = vsyncpa [#allocation4], 0  ;;  %s1674_s21 = smov [#allocation5]   ;;  %s1556_s25 = scalar_lea.hbm %s1908_s2, 4096 }
   0x4   :  { %s40_s22 = sshll.u32 %s1674_s21, 4  ;;  %p1557_p0 = scmp.ne.s32.totalorder %s1908_s2, %s1556_s25  ;;  %s41_s22 = int_to_ptr.vmem [resolvable:$true] %s40_s22 }
   0x5   :  { %p1560_p1 = scmp.lt.u32.totalorder %s1556_s25, %s1908_s2 }
   0x7   :  { %p1562_p2 = pnand %p1560_p1, %p1557_p0 }
   0x9   :  { %1565 = shalt.err (!%p1562_p2)
}
   0xa   :  { %s1566_s30 = scalar_lea.vmem %s41_s22, 4096  ;;  %p1571_p4 = scmp.lt.s32.totalorder %s41_s22, %s41_s22 }
   0xb   :  { %p1567_p3 = scmp.ne.s32.totalorder %s41_s22, %s1566_s30  ;;  %p1572_p5 = scmp.lt.s32.totalorder %s1566_s30, %s1566_s30 }
   0xd   :  { %p1573_p6 = por %p1572_p5, %p1571_p4 }
   0xf   :  { %p1574_p7 = pnand %p1573_p6, %p1567_p3 }
  0x11   :  { %1577 = shalt.err (!%p1574_p7)
}
  0x12   :  { %s1675_s13 = smov 64   ;;  %s1676_s14 = smov 4  }
  0x13   :  { %46 = dma.hbm_to_vmem [thread:$0]  %s1908_s2, 4096, %s41_s22, [#allocation6], %s1675_s13, %s1675_s13, %s1676_s14  }
  0x14   :  { %s1677_s17 = smov [#allocation2]   ;;  %s1578_s21 = scalar_lea.hbm %s1907_s1, 4096 }
  0x15   :  { %s28_s18 = sshll.u32 %s1677_s17, 4  ;;  %p1579_p8 = scmp.ne.s32.totalorder %s1907_s1, %s1578_s21  ;;  %s29_s18 = int_to_ptr.vmem [resolvable:$true] %s28_s18 }
  0x16   :  { %p1582_p9 = scmp.lt.u32.totalorder %s1578_s21, %s1907_s1 }
  0x18   :  { %p1584_p10 = pnand %p1582_p9, %p1579_p8 }
  0x1a   :  { %1587 = shalt.err (!%p1584_p10)
}
  0x1b   :  { %s1588_s27 = scalar_lea.vmem %s29_s18, 4096  ;;  %p1593_p12 = scmp.lt.s32.totalorder %s29_s18, %s29_s18 }
  0x1c   :  { %p1589_p11 = scmp.ne.s32.totalorder %s29_s18, %s1588_s27  ;;  %p1594_p13 = scmp.lt.s32.totalorder %s1588_s27, %s1588_s27 }
  0x1e   :  { %p1595_p0 = por %p1594_p13, %p1593_p12 }
  0x20   :  { %p1596_p1 = pnand %p1595_p0, %p1589_p11 }
  0x22   :  { %1599 = shalt.err (!%p1596_p1)
}
  0x23   :  { %s1678_s2 = smov 256   ;;  %s1679_s22 = smov 16  }
  0x24   :  { %34 = dma.hbm_to_vmem [thread:$0]  %s1907_s1, 4096, %s29_s18, [#allocation3], %s1678_s2, %s1678_s2, %s1679_s22  }
  0x25   :  { %s1680_s30 = smov [#allocation7]   ;;  %s1681_s16 = smov [#allocation8]  }
  0x26   :  { %s52_s15 = sshll.u32 %s1680_s30, 4  ;;  %s64_s17 = sshll.u32 %s1681_s16, 4  ;;  %s53_s15 = int_to_ptr.vmem [resolvable:$true] %s52_s15  ;;  %s1779_s17 = int_to_ptr.vmem [resolvable:$true] %s64_s17 }
  0x27   :  { %s1600_s21 = scalar_lea.hbm %s1909_s3, 1024 }
  0x28   :  { %p1601_p2 = scmp.ne.s32.totalorder %s1909_s3, %s1600_s21  ;;  %p1604_p3 = scmp.lt.u32.totalorder %s1600_s21, %s1909_s3 }
  0x2a   :  { %p1606_p4 = pnand %p1604_p3, %p1601_p2 }
  0x2c   :  { %1609 = shalt.err (!%p1606_p4)
}
  0x2d   :  { %s1610_s1 = scalar_lea.vmem %s53_s15, 1024  ;;  %p1615_p6 = scmp.lt.s32.totalorder %s53_s15, %s53_s15 }
  0x2e   :  { %p1611_p5 = scmp.ne.s32.totalorder %s53_s15, %s1610_s1  ;;  %p1616_p7 = scmp.lt.s32.totalorder %s1610_s1, %s1610_s1 }
  0x30   :  { %p1617_p8 = por %p1616_p7, %p1615_p6 }
  0x32   :  { %p1618_p9 = pnand %p1617_p8, %p1611_p5 }
  0x34   :  { %1621 = shalt.err (!%p1618_p9)
}
  0x35   :  { %58 = dma.hbm_to_vmem [thread:$0]  %s1909_s3, 1024, %s53_s15, [#allocation6], %s1675_s13, %s1675_s13, %s1676_s14  }
  0x36   :  { %s1622_s28 = scalar_lea.hbm %s1910_s4, 1024 }
  0x37   :  { %p1623_p10 = scmp.ne.s32.totalorder %s1910_s4, %s1622_s28  ;;  %p1626_p11 = scmp.lt.u32.totalorder %s1622_s28, %s1910_s4 }
  0x39   :  { %p1628_p12 = pnand %p1626_p11, %p1623_p10 }
  0x3b   :  { %1631 = shalt.err (!%p1628_p12)
}
  0x3c   :  { %s1632_s20 = scalar_lea.vmem %s1779_s17, 1024  ;;  %p1637_p0 = scmp.lt.s32.totalorder %s1779_s17, %s1779_s17 }
  0x3d   :  { %p1633_p13 = scmp.ne.s32.totalorder %s1779_s17, %s1632_s20  ;;  %p1638_p1 = scmp.lt.s32.totalorder %s1632_s20, %s1632_s20 }
  0x3f   :  { %p1639_p2 = por %p1638_p1, %p1637_p0 }
  0x41   :  { %p1640_p3 = pnand %p1639_p2, %p1633_p13 }
  0x43   :  { %1643 = shalt.err (!%p1640_p3)
}
  0x44   :  { %70 = dma.hbm_to_vmem [thread:$0]  %s1910_s4, 1024, %s1779_s17, [#allocation9], %s1675_s13, %s1675_s13, %s1676_s14  }
  0x45   :  { %1666 = dma.done.wait [#allocation3], 4096  }
  0x46   :  { %1667 = vsyncadd [#allocation3], 4294963200 }
  0x47   :  { %1668 = dma.done.wait [#allocation6], 5120  }
  0x48   :  { %1669 = vsyncadd [#allocation6], 4294962176 }
  0x49   :  { %1670 = dma.done.wait [#allocation9], 1024  }
  0x4a   :  { %1671 = vsyncadd [#allocation9], 4294966272  ;;  %v1682_v0 = vmov 0   ;;  %v1444_v1 = vld [vmem:[#allocation2 + $0x4] ss:$16 sps:$4 sm:$0xff]   ;;  %v98_v33 = vld [vmem:[%s1906_s0] sm:$0xff] }
  0x4b   :  { %324 = vmatprep.mubr.bf16.mxu0 %v1682_v0  ;;  %365 = vmatprep.mubr.bf16.mxu1 %v1682_v0  ;;  %v1446_v2 = vld [vmem:[#allocation2 + $0xc] ss:$16 sps:$4 sm:$0xff]   ;;  %v1448_v3 = vld [vmem:[#allocation2] ss:$16 sps:$4 sm:$0xff]   ;;  %v1449_v4 = vld [vmem:[#allocation2 + $0x8] ss:$16 sps:$4 sm:$0xff]   ;;  %v99_v34 = vpack.c.bf16 %v98_v33, %v98_v33 }
  0x4c   :  { %292 = vmatprep.subr.bf16.mxu0 %v1444_v1  ;;  %333 = vmatprep.subr.bf16.mxu1 %v1446_v2  ;;  %v1450_v5 = vld [vmem:[#allocation2 + $0x24] ss:$16 sps:$4 sm:$0xff]   ;;  %v1452_v6 = vld [vmem:[#allocation2 + $0x2c] ss:$16 sps:$4 sm:$0xff]   ;;  %v1454_v7 = vld [vmem:[#allocation2 + $0x20] ss:$16 sps:$4 sm:$0xff]  }
  0x4d   :  { %293 = vmatpush1.bf16.msra.mxu0 %v1448_v3  ;;  %334 = vmatpush1.bf16.msra.mxu1 %v1449_v4  ;;  %v1455_v8 = vld [vmem:[#allocation2 + $0x28] ss:$16 sps:$4 sm:$0xff]   ;;  %v1456_v9 = vld [vmem:[#allocation2 + $0x44] ss:$16 sps:$4 sm:$0xff]   ;;  %v1458_v10 = vld [vmem:[#allocation2 + $0x4c] ss:$16 sps:$4 sm:$0xff]  }
  0x4e   :  { %294 = vmatprep.subr.bf16.mxu0 %v1450_v5  ;;  %335 = vmatprep.subr.bf16.mxu1 %v1452_v6  ;;  %v1460_v11 = vld [vmem:[#allocation2 + $0x40] ss:$16 sps:$4 sm:$0xff]   ;;  %v1461_v12 = vld [vmem:[#allocation2 + $0x48] ss:$16 sps:$4 sm:$0xff]   ;;  %v1462_v13 = vld [vmem:[#allocation2 + $0x64] ss:$16 sps:$4 sm:$0xff]  }
  0x4f   :  { %v1464_v14 = vld [vmem:[#allocation2 + $0x6c] ss:$16 sps:$4 sm:$0xff]   ;;  %v1466_v15 = vld [vmem:[#allocation2 + $0x60] ss:$16 sps:$4 sm:$0xff]   ;;  %v1467_v16 = vld [vmem:[#allocation2 + $0x68] ss:$16 sps:$4 sm:$0xff]  }
  0x50   :  { %v1468_v17 = vld [vmem:[#allocation2 + $0x84] ss:$16 sps:$4 sm:$0xff]   ;;  %v1470_v18 = vld [vmem:[#allocation2 + $0x8c] ss:$16 sps:$4 sm:$0xff]   ;;  %v1472_v19 = vld [vmem:[#allocation2 + $0x80] ss:$16 sps:$4 sm:$0xff]  }
  0x51   :  { %295 = vmatpush1.bf16.msra.mxu0 %v1454_v7  ;;  %336 = vmatpush1.bf16.msra.mxu1 %v1455_v8  ;;  %v1473_v20 = vld [vmem:[#allocation2 + $0x88] ss:$16 sps:$4 sm:$0xff]   ;;  %v1474_v21 = vld [vmem:[#allocation2 + $0xa4] ss:$16 sps:$4 sm:$0xff]   ;;  %v1476_v22 = vld [vmem:[#allocation2 + $0xac] ss:$16 sps:$4 sm:$0xff]  }
  0x52   :  { %296 = vmatprep.subr.bf16.mxu0 %v1456_v9  ;;  %337 = vmatprep.subr.bf16.mxu1 %v1458_v10  ;;  %v1478_v23 = vld [vmem:[#allocation2 + $0xa0] ss:$16 sps:$4 sm:$0xff]   ;;  %v1479_v24 = vld [vmem:[#allocation2 + $0xa8] ss:$16 sps:$4 sm:$0xff]   ;;  %v1480_v25 = vld [vmem:[#allocation2 + $0xc4] ss:$16 sps:$4 sm:$0xff]  }
  0x53   :  { %v1482_v26 = vld [vmem:[#allocation2 + $0xcc] ss:$16 sps:$4 sm:$0xff]   ;;  %v1484_v27 = vld [vmem:[#allocation2 + $0xc0] ss:$16 sps:$4 sm:$0xff]   ;;  %v1485_v28 = vld [vmem:[#allocation2 + $0xc8] ss:$16 sps:$4 sm:$0xff]  }
  0x54   :  { %v1486_v29 = vld [vmem:[#allocation2 + $0xe4] ss:$16 sps:$4 sm:$0xff]   ;;  %v1488_v30 = vld [vmem:[#allocation2 + $0xec] ss:$16 sps:$4 sm:$0xff]   ;;  %v1490_v31 = vld [vmem:[#allocation2 + $0xe0] ss:$16 sps:$4 sm:$0xff]  }
  0x55   :  { %297 = vmatpush1.bf16.msra.mxu0 %v1460_v11  ;;  %338 = vmatpush1.bf16.msra.mxu1 %v1461_v12  ;;  %v1491_v32 = vld [vmem:[#allocation2 + $0xe8] ss:$16 sps:$4 sm:$0xff]   ;;  %v1492_v35 = vld [vmem:[#allocation5 + $0x40] sm:$0xff]   ;;  %v1500_v43 = vld [vmem:[#allocation5 + $0x50] sm:$0xff]   ;;  %vm1685_vm4 = vmmov 0  }
  0x56   :  { %298 = vmatprep.subr.bf16.mxu0 %v1462_v13  ;;  %339 = vmatprep.subr.bf16.mxu1 %v1464_v14  ;;  %v1493_v36 = vld [vmem:[#allocation5 + $0xc0] sm:$0xff]   ;;  %v1496_v39 = vld [vmem:[#allocation5 + $0x48] sm:$0xff]   ;;  %v1501_v44 = vld [vmem:[#allocation5 + $0xd0] sm:$0xff]  }
  0x57   :  { %v1494_v37 = vld [vmem:[#allocation5] sm:$0xff]   ;;  %v1497_v40 = vld [vmem:[#allocation5 + $0xc8] sm:$0xff]   ;;  %v1502_v45 = vld [vmem:[#allocation5 + $0x10] sm:$0xff]  }
  0x58   :  { %v1495_v38 = vld [vmem:[#allocation5 + $0x80] sm:$0xff]   ;;  %v1498_v41 = vld [vmem:[#allocation5 + $0x8] sm:$0xff]   ;;  %v1503_v46 = vld [vmem:[#allocation5 + $0x90] sm:$0xff]  }
  0x59   :  { %299 = vmatpush1.bf16.msra.mxu0 %v1466_v15  ;;  %340 = vmatpush1.bf16.msra.mxu1 %v1467_v16  ;;  %v1499_v42 = vld [vmem:[#allocation5 + $0x88] sm:$0xff]   ;;  %v1504_v47 = vld [vmem:[#allocation5 + $0x58] sm:$0xff]   ;;  %v1508_v51 = vld [vmem:[#allocation5 + $0x60] sm:$0xff]  }
  0x5a   :  { %300 = vmatprep.subr.bf16.mxu0 %v1468_v17  ;;  %341 = vmatprep.subr.bf16.mxu1 %v1470_v18  ;;  %v1505_v48 = vld [vmem:[#allocation5 + $0xd8] sm:$0xff]   ;;  %v1509_v52 = vld [vmem:[#allocation5 + $0xe0] sm:$0xff]   ;;  %v1512_v55 = vld [vmem:[#allocation5 + $0x68] sm:$0xff]  }
  0x5b   :  { %v1506_v49 = vld [vmem:[#allocation5 + $0x18] sm:$0xff]   ;;  %v1510_v53 = vld [vmem:[#allocation5 + $0x20] sm:$0xff]   ;;  %v1513_v56 = vld [vmem:[#allocation5 + $0xe8] sm:$0xff]  }
  0x5c   :  { %v1507_v50 = vld [vmem:[#allocation5 + $0x98] sm:$0xff]   ;;  %v1511_v54 = vld [vmem:[#allocation5 + $0xa0] sm:$0xff]   ;;  %v1514_v57 = vld [vmem:[#allocation5 + $0x28] sm:$0xff]  }
  0x5d   :  { %301 = vmatpush1.bf16.msra.mxu0 %v1472_v19  ;;  %342 = vmatpush1.bf16.msra.mxu1 %v1473_v20  ;;  %v1515_v58 = vld [vmem:[#allocation5 + $0xa8] sm:$0xff]   ;;  %v1516_v59 = vld [vmem:[#allocation5 + $0x70] sm:$0xff]   ;;  %v1520_v63 = vld [vmem:[#allocation5 + $0x78] sm:$0xff]  }
  0x5e   :  { %302 = vmatprep.subr.bf16.mxu0 %v1474_v21  ;;  %343 = vmatprep.subr.bf16.mxu1 %v1476_v22  ;;  %v1517_v60 = vld [vmem:[#allocation5 + $0xf0] sm:$0xff]   ;;  %v1521_v0 = vld [vmem:[#allocation5 + $0xf8] sm:$0xff]  }
  0x5f   :  { %v1518_v61 = vld [vmem:[#allocation5 + $0x30] sm:$0xff]   ;;  %v1522_v1 = vld [vmem:[#allocation5 + $0x38] sm:$0xff]  }
  0x60   :  { %v1519_v62 = vld [vmem:[#allocation5 + $0xb0] sm:$0xff]   ;;  %v1523_v2 = vld [vmem:[#allocation5 + $0xb8] sm:$0xff]  }
  0x61   :  { %303 = vmatpush1.bf16.msra.mxu0 %v1478_v23  ;;  %344 = vmatpush1.bf16.msra.mxu1 %v1479_v24 }
  0x62   :  { %304 = vmatprep.subr.bf16.mxu0 %v1480_v25  ;;  %345 = vmatprep.subr.bf16.mxu1 %v1482_v26 }
  0x65   :  { %305 = vmatpush1.bf16.msra.mxu0 %v1484_v27  ;;  %346 = vmatpush1.bf16.msra.mxu1 %v1485_v28 }
  0x66   :  { %306 = vmatprep.subr.bf16.mxu0 %v1486_v29  ;;  %347 = vmatprep.subr.bf16.mxu1 %v1488_v30 }
  0x69   :  { %307 = vmatpush1.bf16.msra.mxu0 %v1490_v31  ;;  %348 = vmatpush1.bf16.msra.mxu1 %v1491_v32 }
  0x6a   :  { %1329 = vmatprep.subr.bf16.mxu0 %v1492_v35  ;;  %1351 = vmatprep.subr.bf16.mxu1 %v1493_v36 }
  0x6c   :  { %325 = vmatmul.mubr.bf16.vlgmr.msra.gmra.mrb[0].mxu0 %v99_v34  ;;  %366 = vmatmul.mubr.bf16.vlgmr.msra.gmra.mrb[0].mxu1 %v99_v34 }
  0x6d   :  { %1330 = vmatpush3.bf16.msra.mxu0 %v1494_v37  ;;  %1352 = vmatpush3.bf16.msra.mxu1 %v1495_v38 }
  0x6e   :  { %1331 = vmatprep.subr.bf16.mxu0 %v1496_v39  ;;  %1353 = vmatprep.subr.bf16.mxu1 %v1497_v40 }
  0x71   :  { %1332 = vmatpush3.bf16.msra.mxu0 %v1498_v41  ;;  %1354 = vmatpush3.bf16.msra.mxu1 %v1499_v42 }
  0x72   :  { %1333 = vmatprep.subr.bf16.mxu0 %v1500_v43  ;;  %1355 = vmatprep.subr.bf16.mxu1 %v1501_v44 }
  0x75   :  { %1334 = vmatpush3.bf16.msra.mxu0 %v1502_v45  ;;  %1356 = vmatpush3.bf16.msra.mxu1 %v1503_v46 }
  0x76   :  { %1335 = vmatprep.subr.bf16.mxu0 %v1504_v47  ;;  %1357 = vmatprep.subr.bf16.mxu1 %v1505_v48 }
  0x79   :  { %1336 = vmatpush3.bf16.msra.mxu0 %v1506_v49  ;;  %1358 = vmatpush3.bf16.msra.mxu1 %v1507_v50 }
  0x7a   :  { %1337 = vmatprep.subr.bf16.mxu0 %v1508_v51  ;;  %1359 = vmatprep.subr.bf16.mxu1 %v1509_v52 }
  0x7d   :  { %1338 = vmatpush3.bf16.msra.mxu0 %v1510_v53  ;;  %1360 = vmatpush3.bf16.msra.mxu1 %v1511_v54 }
  0x7e   :  { %1339 = vmatprep.subr.bf16.mxu0 %v1512_v55  ;;  %1361 = vmatprep.subr.bf16.mxu1 %v1513_v56 }
  0x81   :  { %1340 = vmatpush3.bf16.msra.mxu0 %v1514_v57  ;;  %1362 = vmatpush3.bf16.msra.mxu1 %v1515_v58 }
  0x82   :  { %1341 = vmatprep.subr.bf16.mxu0 %v1516_v59  ;;  %1363 = vmatprep.subr.bf16.mxu1 %v1517_v60 }
  0x85   :  { %1342 = vmatpush3.bf16.msra.mxu0 %v1518_v61  ;;  %1364 = vmatpush3.bf16.msra.mxu1 %v1519_v62 }
  0x86   :  { %1343 = vmatprep.subr.bf16.mxu0 %v1520_v63  ;;  %1365 = vmatprep.subr.bf16.mxu1 %v1521_v0 }
  0x89   :  { %1344 = vmatpush3.bf16.msra.mxu0 %v1522_v1  ;;  %1366 = vmatpush3.bf16.msra.mxu1 %v1523_v2 }
 0x13f   :  { %v1819_v3 = vpop.f32.mrb[0].mxu0  ;;  %v1821_v4 = vpop.f32.mrb[0].mxu1 }
 0x140   :  { %v374_v5 = vrot.slane %v1819_v3, 4  ;;  %v402_v6 = vmul.f32 %v1819_v3, %v1819_v3  ;;  %v386_v7 = vrot.slane %v1821_v4, 4  ;;  %v404_v8 = vmul.f32 %v1821_v4, %v1821_v4  ;;  %v1829_v9 = vpop.f32.mrb[1].mxu0  ;;  %v1831_v10 = vpop.f32.mrb[1].mxu1 }
 0x141   :  { %v380_v11 = vrot.slane %v1829_v9, 4  ;;  %v403_v12 = vmul.f32 %v1829_v9, %v1829_v9  ;;  %v392_v13 = vrot.slane %v1831_v10, 4  ;;  %v405_v14 = vmul.f32 %v1831_v10, %v1831_v10  ;;  %v330_v15 = vpop.f32.mrb[2].mxu0  ;;  %v371_v16 = vpop.f32.mrb[2].mxu1 }
 0x142   :  { %v375_v17 = vadd.f32 %v374_v5, %v1819_v3  ;;  %v406_v18 = vrot.slane %v402_v6, 4  ;;  %v387_v19 = vadd.f32 %v386_v7, %v1821_v4  ;;  %v418_v20 = vrot.slane %v404_v8, 4  ;;  %v331_v21 = vpop.f32.mrb[3].mxu0  ;;  %v372_v22 = vpop.f32.mrb[3].mxu1 }
 0x143   :  { %v381_v23 = vadd.f32 %v380_v11, %v1829_v9  ;;  %v412_v24 = vrot.slane %v403_v12, 4  ;;  %v393_v25 = vadd.f32 %v392_v13, %v1831_v10  ;;  %v424_v26 = vrot.slane %v405_v14, 4 }
 0x144   :  { %v376_v27 = vrot.slane %v375_v17, 2  ;;  %v407_v28 = vadd.f32 %v406_v18, %v402_v6  ;;  %v388_v29 = vrot.slane %v387_v19, 2  ;;  %v419_v30 = vadd.f32 %v418_v20, %v404_v8 }
 0x145   :  { %v382_v31 = vrot.slane %v381_v23, 2  ;;  %v413_v32 = vadd.f32 %v412_v24, %v403_v12  ;;  %v394_v33 = vrot.slane %v393_v25, 2  ;;  %v425_v34 = vadd.f32 %v424_v26, %v405_v14 }
 0x146   :  { %v377_v35 = vadd.f32 %v376_v27, %v375_v17  ;;  %v408_v36 = vrot.slane %v407_v28, 2  ;;  %v389_v37 = vadd.f32 %v388_v29, %v387_v19  ;;  %v420_v38 = vrot.slane %v419_v30, 2 }
 0x147   :  { %v383_v39 = vadd.f32 %v382_v31, %v381_v23  ;;  %v414_v40 = vrot.slane %v413_v32, 2  ;;  %v395_v41 = vadd.f32 %v394_v33, %v393_v25  ;;  %v426_v42 = vrot.slane %v425_v34, 2 }
 0x148   :  { %v378_v43 = vrot.slane %v377_v35, 1  ;;  %v409_v44 = vadd.f32 %v408_v36, %v407_v28  ;;  %v390_v45 = vrot.slane %v389_v37, 1  ;;  %v421_v46 = vadd.f32 %v420_v38, %v419_v30 }
 0x149   :  { %v384_v47 = vrot.slane %v383_v39, 1  ;;  %v415_v48 = vadd.f32 %v414_v40, %v413_v32  ;;  %v396_v49 = vrot.slane %v395_v41, 1  ;;  %v427_v50 = vadd.f32 %v426_v42, %v425_v34  ;;  %v454_v42 = vld [vmem:[%s1912_s6] sm:$0xf] }
 0x14a   :  { %v379_v51 = vadd.f32 %v378_v43, %v377_v35  ;;  %v410_v52 = vrot.slane %v409_v44, 1  ;;  %v391_v53 = vadd.f32 %v390_v45, %v389_v37  ;;  %v422_v54 = vrot.slane %v421_v46, 1 }
 0x14b   :  { %v385_v55 = vadd.f32 %v384_v47, %v383_v39  ;;  %v416_v56 = vrot.slane %v415_v48, 1  ;;  %v397_v57 = vadd.f32 %v396_v49, %v395_v41  ;;  %v428_v58 = vrot.slane %v427_v50, 1 }
 0x14c   :  { %v398_v59 = vmul.f32 0.125, %v379_v51  ;;  %v411_v60 = vadd.f32 %v410_v52, %v409_v44  ;;  %v400_v61 = vmul.f32 0.125, %v391_v53  ;;  %v423_v62 = vadd.f32 %v422_v54, %v421_v46 }
 0x14d   :  { %v399_v63 = vmul.f32 0.125, %v385_v55  ;;  %v417_v0 = vadd.f32 %v416_v56, %v415_v48  ;;  %v401_v1 = vmul.f32 0.125, %v397_v57  ;;  %v429_v2 = vadd.f32 %v428_v58, %v427_v50 }
 0x14e   :  { %v430_v5 = vmul.f32 0.125, %v411_v60  ;;  %v434_v6 = vmul.f32 %v398_v59, %v398_v59  ;;  %v432_v7 = vmul.f32 0.125, %v423_v62  ;;  %v436_v8 = vmul.f32 %v400_v61, %v400_v61 }
 0x14f   :  { %v431_v11 = vmul.f32 0.125, %v417_v0  ;;  %v435_v12 = vmul.f32 %v399_v63, %v399_v63  ;;  %v433_v13 = vmul.f32 0.125, %v429_v2  ;;  %v437_v14 = vmul.f32 %v401_v1, %v401_v1 }
 0x150   :  { %v438_v15 = vsub.f32 %v430_v5, %v434_v6  ;;  %v440_v16 = vsub.f32 %v432_v7, %v436_v8  ;;  %v1683_v27 = vmov 1966171168   ;;  %v464_v29 = vlaneseq }
 0x151   :  { %v439_v17 = vsub.f32 %v431_v11, %v435_v12  ;;  %v441_v18 = vsub.f32 %v433_v13, %v437_v14  ;;  %v462_v28 = vunpack.c.l.s4 %v1683_v27  ;;  %v1525_v27 = vld [vmem:[#allocation7 + $0x8] sm:$0xff]  }
 0x152   :  { %v442_v19 = vmax.f32 %v438_v15, 0.0  ;;  %v444_v20 = vmax.f32 %v440_v16, 0.0  ;;  %v465_v31 = vshrl.u32 %v464_v29, 7  ;;  %v1527_v29 = vld [vmem:[#allocation7 + $0x18] sm:$0xff]  }
 0x153   :  { %v443_v21 = vmax.f32 %v439_v17, 0.0  ;;  %v445_v22 = vmax.f32 %v441_v18, 0.0  ;;  %v463_v30 = vunpack.c.0.s8 %v462_v28  ;;  %v1526_v28 = vld [vmem:[#allocation7 + $0x10] sm:$0xff]  }
 0x154   :  { %v446_v23 = vadd.f32 1e-05, %v442_v19  ;;  %v448_v24 = vadd.f32 1e-05, %v444_v20  ;;  %v1846_v43 = vsub.s32 0, %v465_v31  ;;  %v493_v45 = vsub.s32 1, %v465_v31 }
 0x155   :  { %v447_v25 = vadd.f32 1e-05, %v443_v21  ;;  %v449_v26 = vadd.f32 1e-05, %v445_v22  ;;  %v466_v34 = vsub.s32 %v463_v30, %v465_v31  ;;  %v497_v46 = vsub.s32 2, %v465_v31  ;;  %v1528_v30 = vld [vmem:[#allocation7 + $0x20] sm:$0xff]  }
 0x156   :  { %1540 = vrsqrt.f32 %v446_v23  ;;  %v501_v47 = vsub.s32 3, %v465_v31  ;;  %v1529_v31 = vld [vmem:[#allocation7 + $0x28] sm:$0xff]  }
 0x157   :  { %1542 = vrsqrt.f32 %v448_v24 }
 0x158   :  { %1544 = vrsqrt.f32 %v447_v25  ;;  %v1524_v25 = vld [vmem:[#allocation7] sm:$0xff]  }
 0x159   :  { %1546 = vrsqrt.f32 %v449_v26  ;;  %v1684_v26 = vmov 0.0  }
 0x15a   :  { %1391 = vmatprep.subr.bf16.mxu0 %v1684_v26  ;;  %1411 = vmatprep.subr.bf16.mxu1 %v1684_v26 }
 0x160   :  { %v1541_v32 = vpop.eup %1540 }
 0x161   :  { %v1543_v33 = vpop.eup %1542 }
 0x162   :  { %v1545_v35 = vpop.eup %1544 }
 0x163   :  { %v1547_v36 = vpop.eup %1546  ;;  %v459_v37 = vcombine.low %v1541_v32, %v1545_v35  ;;  %v1530_v32 = vld [vmem:[#allocation7 + $0x30] sm:$0xff]  }
 0x164   :  { %v460_v38 = vcombine.low %v1543_v33, %v1547_v36  ;;  %v1531_v33 = vld [vmem:[#allocation7 + $0x38] sm:$0xff]  }
 0x165   :  { %v467_v39 = vrot.slane %v459_v37, %v466_v34 }
 0x166   :  { %v474_v40 = vrot.slane %v460_v38, %v466_v34 }
 0x168   :  { %v475_v41 = vcombine.low %v467_v39, %v474_v40 }
 0x16a   :  { %v482_v44 = vrot.slane %v475_v41, %v466_v34 }
 0x16c   :  { %v484_v48 = vmul.f32 %v482_v44, %v454_v42 }
 0x16e   :  { %v490_v49 = vrot.slane %v484_v48, %v1846_v43  ;;  %v494_v50 = vrot.slane %v484_v48, %v493_v45  ;;  %v498_v51 = vrot.slane %v484_v48, %v497_v46  ;;  %v502_v52 = vrot.slane %v484_v48, %v501_v47 }
 0x170   :  { %v507_v53 = vmul.f32 %v490_v49, %v398_v59  ;;  %v508_v54 = vmul.f32 %v494_v50, %v399_v63  ;;  %v509_v55 = vmul.f32 %v498_v51, %v400_v61  ;;  %v510_v56 = vmul.f32 %v502_v52, %v401_v1  ;;  %v485_v59 = vld [vmem:[%s1913_s7] sm:$0xf] }
 0x171   :  { %v544_v57 = vmul.f32 %v502_v52, %v1831_v10  ;;  %v542_v58 = vmul.f32 %v494_v50, %v1829_v9  ;;  %v541_v60 = vmul.f32 %v490_v49, %v1819_v3  ;;  %v543_v62 = vmul.f32 %v498_v51, %v1821_v4 }
 0x172   :  { %v515_v0 = vcombine.low %v507_v53, %v508_v54  ;;  %v516_v2 = vcombine.low %v509_v55, %v510_v56 }
 0x174   :  { %v523_v5 = vrot.slane %v515_v0, %v466_v34  ;;  %v530_v6 = vrot.slane %v516_v2, %v466_v34 }
 0x176   :  { %v531_v7 = vcombine.low %v523_v5, %v530_v6 }
 0x178   :  { %v538_v63 = vrot.slane %v531_v7, %v466_v34  ;;  %v942_v7 = vld [vmem:[%s1914_s8] sm:$0x1] }
 0x17a   :  { %v540_v61 = vsub.f32 %v485_v59, %v538_v63 }
 0x17c   :  { %v561_v1 = vrot.slane %v540_v61, %v501_v47  ;;  %v553_v8 = vrot.slane %v540_v61, %v493_v45  ;;  %v549_v10 = vrot.slane %v540_v61, %v1846_v43  ;;  %v557_v9 = vrot.slane %v540_v61, %v497_v46  ;;  %v944_v61 = vld [vmem:[%s1915_s9] sm:$0x1] }
 0x17e   :  { %v569_v11 = vadd.f32 %v561_v1, %v544_v57  ;;  %v567_v3 = vadd.f32 %v553_v8, %v542_v58  ;;  %v566_v12 = vadd.f32 %v549_v10, %v541_v60  ;;  %v568_v4 = vadd.f32 %v557_v9, %v543_v62 }
 0x180   :  { %vm571_vm0 = vcmp.ge.f32.partialorder %v567_v3, 0.0  ;;  %v575_v13 = vmul.f32 0.2, %v567_v3  ;;  %vm573_vm1 = vcmp.ge.f32.partialorder %v569_v11, 0.0  ;;  %v577_v14 = vmul.f32 0.2, %v569_v11 }
 0x181   :  { %vm570_vm2 = vcmp.ge.f32.partialorder %v566_v12, 0.0  ;;  %v574_v15 = vmul.f32 0.2, %v566_v12  ;;  %vm572_vm3 = vcmp.ge.f32.partialorder %v568_v4, 0.0  ;;  %v576_v16 = vmul.f32 0.2, %v568_v4 }
 0x182   :  { %v579_v17 = vsel %vm571_vm0, %v567_v3, %v575_v13  ;;  %v581_v18 = vsel %vm573_vm1, %v569_v11, %v577_v14  ;;  %v1532_v14 = vld [vmem:[#allocation8] sm:$0xff]  }
 0x183   :  { %v583_v19 = vpack.c.bf16 %v579_v17, %v579_v17  ;;  %v585_v20 = vpack.c.bf16 %v581_v18, %v581_v18  ;;  %v578_v21 = vsel %vm570_vm2, %v566_v12, %v574_v15  ;;  %v580_v22 = vsel %vm572_vm3, %v568_v4, %v576_v16  ;;  %v1533_v15 = vld [vmem:[#allocation8 + $0x8] sm:$0xff]   ;;  %v1534_v16 = vld [vmem:[#allocation8 + $0x10] sm:$0xff]   ;;  %v1535_v17 = vld [vmem:[#allocation8 + $0x18] sm:$0xff]  }
 0x184   :  { %v582_v23 = vpack.c.bf16 %v578_v21, %v578_v21  ;;  %v584_v24 = vpack.c.bf16 %v580_v22, %v580_v22  ;;  %v1536_v18 = vld [vmem:[#allocation8 + $0x20] sm:$0xff]   ;;  %v1539_v21 = vld [vmem:[#allocation8 + $0x38] sm:$0xff]  }
 0x185   :  { %874 = vmatprep.mubr.bf16.mxu0 %v583_v19  ;;  %914 = vmatprep.mubr.bf16.mxu1 %v585_v20  ;;  %v1537_v19 = vld [vmem:[#allocation8 + $0x28] sm:$0xff]   ;;  %v1538_v20 = vld [vmem:[#allocation8 + $0x30] sm:$0xff]  }
 0x186   :  { %875 = vmatmul.mubr.bf16.vlgmr.msra.gmra.mrb[4].mxu0 %v582_v23  ;;  %915 = vmatmul.mubr.bf16.vlgmr.msra.gmra.mrb[4].mxu1 %v584_v24 }
 0x187   :  { %1392 = vmatpush3.bf16.msra.mxu0 %v1524_v25  ;;  %1407 = vmatprep.mubr.msk.bf16.mxu0 %vm1685_vm4, %v1684_v26 }
 0x188   :  { %1393 = vmatprep.subr.bf16.mxu0 %v1684_v26  ;;  %1427 = vmatprep.mubr.msk.bf16.mxu1 %vm1685_vm4, %v1684_v26 }
 0x189   :  { %1412 = vmatpush3.bf16.msra.mxu1 %v1532_v14 }
 0x18a   :  { %1413 = vmatprep.subr.bf16.mxu1 %v1684_v26 }
 0x18b   :  { %1394 = vmatpush3.bf16.msra.mxu0 %v1525_v27 }
 0x18c   :  { %1395 = vmatprep.subr.bf16.mxu0 %v1684_v26 }
 0x18d   :  { %1414 = vmatpush3.bf16.msra.mxu1 %v1533_v15 }
 0x18e   :  { %1415 = vmatprep.subr.bf16.mxu1 %v1684_v26 }
 0x18f   :  { %1396 = vmatpush3.bf16.msra.mxu0 %v1526_v28 }
 0x190   :  { %1397 = vmatprep.subr.bf16.mxu0 %v1684_v26 }
 0x191   :  { %1416 = vmatpush3.bf16.msra.mxu1 %v1534_v16 }
 0x192   :  { %1417 = vmatprep.subr.bf16.mxu1 %v1684_v26 }
 0x193   :  { %1398 = vmatpush3.bf16.msra.mxu0 %v1527_v29 }
 0x194   :  { %1399 = vmatprep.subr.bf16.mxu0 %v1684_v26 }
 0x195   :  { %1418 = vmatpush3.bf16.msra.mxu1 %v1535_v17 }
 0x196   :  { %1419 = vmatprep.subr.bf16.mxu1 %v1684_v26 }
 0x197   :  { %1400 = vmatpush3.bf16.msra.mxu0 %v1528_v30 }
 0x198   :  { %1401 = vmatprep.subr.bf16.mxu0 %v1684_v26 }
 0x199   :  { %1420 = vmatpush3.bf16.msra.mxu1 %v1536_v18 }
 0x19a   :  { %1421 = vmatprep.subr.bf16.mxu1 %v1684_v26 }
 0x19b   :  { %1402 = vmatpush3.bf16.msra.mxu0 %v1529_v31 }
 0x19c   :  { %1403 = vmatprep.subr.bf16.mxu0 %v1684_v26 }
 0x19d   :  { %1422 = vmatpush3.bf16.msra.mxu1 %v1537_v19 }
 0x19e   :  { %1423 = vmatprep.subr.bf16.mxu1 %v1684_v26 }
 0x19f   :  { %1404 = vmatpush3.bf16.msra.mxu0 %v1530_v32 }
 0x1a0   :  { %1405 = vmatprep.subr.bf16.mxu0 %v1684_v26 }
 0x1a1   :  { %1424 = vmatpush3.bf16.msra.mxu1 %v1538_v20 }
 0x1a2   :  { %1425 = vmatprep.subr.bf16.mxu1 %v1684_v26 }
 0x1a3   :  { %1406 = vmatpush3.bf16.msra.mxu0 %v1531_v33 }
 0x1a5   :  { %1426 = vmatpush3.bf16.msra.mxu1 %v1539_v21 }
 0x259   :  { %v1345_v34 = vpop.f32.mrb[4].mxu0  ;;  %v1367_v35 = vpop.f32.mrb[4].mxu1 }
 0x25a   :  { %v1346_v36 = vpop.f32.mrb[5].mxu0  ;;  %v1368_v37 = vpop.f32.mrb[5].mxu1 }
 0x25b   :  { %v1347_v38 = vadd.f32 %v1346_v36, %v1345_v34  ;;  %v1369_v39 = vadd.f32 %v1368_v37, %v1367_v35  ;;  %v1348_v40 = vpop.f32.mrb[6].mxu0  ;;  %v1370_v41 = vpop.f32.mrb[6].mxu1 }
 0x25c   :  { %v1349_v42 = vpop.f32.mrb[7].mxu0  ;;  %v1371_v44 = vpop.f32.mrb[7].mxu1 }
 0x25d   :  { %v917_v45 = vadd.f32 %v1369_v39, %v1347_v38 }
 0x25f   :  { %v922_v46 = vrot.slane %v917_v45, 4  ;;  %v929_v47 = vmul.f32 %v917_v45, %v917_v45 }
 0x261   :  { %v923_v48 = vadd.f32 %v922_v46, %v917_v45  ;;  %v930_v49 = vrot.slane %v929_v47, 4  ;;  %v1089_v46 = vld [vmem:[%s1916_s10] sm:$0x1] }
 0x263   :  { %v924_v50 = vrot.slane %v923_v48, 2  ;;  %v931_v51 = vadd.f32 %v930_v49, %v929_v47  ;;  %v1091_v49 = vld [vmem:[%s1917_s11] sm:$0x1]  ;;  %s1686_s11 = smov [#allocation10]  }
 0x264   :  { %s1236_s18 = sshll.u32 %s1686_s11, 4  ;;  %s1237_s18 = int_to_ptr.vmem [resolvable:$true] %s1236_s18 }
 0x265   :  { %v925_v52 = vadd.f32 %v924_v50, %v923_v48  ;;  %v932_v53 = vrot.slane %v931_v51, 2  ;;  %s1644_s27 = scalar_lea.vmem %s1237_s18, 128  ;;  %p1649_p5 = scmp.lt.s32.totalorder %s1237_s18, %s1237_s18 }
 0x266   :  { %p1645_p4 = scmp.ne.s32.totalorder %s1237_s18, %s1644_s27  ;;  %p1650_p6 = scmp.lt.s32.totalorder %s1644_s27, %s1644_s27 }
 0x267   :  { %v926_v54 = vrot.slane %v925_v52, 1  ;;  %v933_v55 = vadd.f32 %v932_v53, %v931_v51 }
 0x268   :  { %p1651_p7 = por %p1650_p6, %p1649_p5 }
 0x269   :  { %v927_v56 = vadd.f32 %v926_v54, %v925_v52  ;;  %v934_v57 = vrot.slane %v933_v55, 1 }
 0x26a   :  { %p1652_p8 = pnand %p1651_p7, %p1645_p4 }
 0x26b   :  { %v928_v58 = vmul.f32 0.125, %v927_v56  ;;  %v935_v60 = vadd.f32 %v934_v57, %v933_v55 }
 0x26d   :  { %v936_v62 = vmul.f32 0.125, %v935_v60  ;;  %v937_v0 = vmul.f32 %v928_v58, %v928_v58  ;;  %v1319_v60 = vld [vmem:[%s1911_s5] ss:$0 sm:$0xff] }
 0x26f   :  { %v938_v2 = vsub.f32 %v936_v62, %v937_v0 }
 0x271   :  { %v939_v5 = vmax.f32 %v938_v2, 0.0 }
 0x273   :  { %v940_v6 = vadd.f32 1e-05, %v939_v5 }
 0x275   :  { %1548 = vrsqrt.f32 %v940_v6 }
 0x27f   :  { %v1549_v59 = vpop.eup %1548 }
 0x280   :  { %v943_v63 = vmul.f32 %v1549_v59, %v942_v7 }
 0x282   :  { %v945_v1 = vmul.f32 %v943_v63, %v928_v58  ;;  %v951_v8 = vrot.slane %v943_v63, %v1846_v43 }
 0x284   :  { %v946_v10 = vsub.f32 %v944_v61, %v945_v1  ;;  %v953_v9 = vmul.f32 %v951_v8, %v917_v45 }
 0x286   :  { %v958_v11 = vrot.slane %v946_v10, %v1846_v43 }
 0x288   :  { %v960_v3 = vadd.f32 %v958_v11, %v953_v9 }
 0x28a   :  { %vm961_vm5 = vcmp.ge.f32.partialorder %v960_v3, 0.0  ;;  %v962_v12 = vmul.f32 0.2, %v960_v3 }
 0x28c   :  { %v963_v4 = vsel %vm961_vm5, %v960_v3, %v962_v12 }
 0x28d   :  { %v964_v13 = vpack.c.bf16 %v963_v4, %v963_v4 }
 0x28f   :  { %1408 = vmatmul.mubr.bf16.vlgmr.msra.gmra.mrb[8].mxu0 %v964_v13 }
 0x362   :  { %v1063_v22 = vpop.f32.mrb[8].mxu0 }
 0x363   :  { %v1069_v23 = vrot.slane %v1063_v22, 4  ;;  %v1076_v24 = vmul.f32 %v1063_v22, %v1063_v22  ;;  %v1409_v25 = vpop.f32.mrb[9].mxu0 }
 0x364   :  { %v1066_v27 = vpop.f32.mrb[10].mxu0 }
 0x365   :  { %v1070_v28 = vadd.f32 %v1069_v23, %v1063_v22  ;;  %v1077_v29 = vrot.slane %v1076_v24, 4  ;;  %v1410_v30 = vpop.f32.mrb[11].mxu0 }
 0x367   :  { %v1071_v31 = vrot.slane %v1070_v28, 2  ;;  %v1078_v32 = vadd.f32 %v1077_v29, %v1076_v24 }
 0x369   :  { %v1072_v33 = vadd.f32 %v1071_v31, %v1070_v28  ;;  %v1079_v34 = vrot.slane %v1078_v32, 2 }
 0x36b   :  { %v1073_v35 = vrot.slane %v1072_v33, 1  ;;  %v1080_v36 = vadd.f32 %v1079_v34, %v1078_v32 }
 0x36d   :  { %v1074_v37 = vadd.f32 %v1073_v35, %v1072_v33  ;;  %v1081_v38 = vrot.slane %v1080_v36, 1 }
 0x36f   :  { %v1075_v39 = vmul.f32 0.125, %v1074_v37  ;;  %v1082_v40 = vadd.f32 %v1081_v38, %v1080_v36 }
 0x371   :  { %v1083_v26 = vmul.f32 0.125, %v1082_v40  ;;  %v1084_v41 = vmul.f32 %v1075_v39, %v1075_v39 }
 0x373   :  { %v1085_v42 = vsub.f32 %v1083_v26, %v1084_v41 }
 0x375   :  { %v1086_v44 = vmax.f32 %v1085_v42, 0.0 }
 0x377   :  { %v1087_v45 = vadd.f32 1e-05, %v1086_v44 }
 0x379   :  { %1550 = vrsqrt.f32 %v1087_v45 }
 0x383   :  { %v1551_v47 = vpop.eup %1550 }
 0x384   :  { %v1090_v48 = vmul.f32 %v1551_v47, %v1089_v46 }
 0x386   :  { %v1092_v50 = vmul.f32 %v1090_v48, %v1075_v39  ;;  %v1098_v51 = vrot.slane %v1090_v48, %v1846_v43 }
 0x388   :  { %v1093_v52 = vsub.f32 %v1091_v49, %v1092_v50  ;;  %v1100_v53 = vmul.f32 %v1098_v51, %v1063_v22 }
 0x38a   :  { %v1105_v54 = vrot.slane %v1093_v52, %v1846_v43 }
 0x38c   :  { %v1107_v55 = vadd.f32 %v1105_v54, %v1100_v53 }
 0x38e   :  { %vm1108_vm6 = vcmp.ge.f32.partialorder %v1107_v55, 0.0  ;;  %v1109_v56 = vmul.f32 0.2, %v1107_v55 }
 0x390   :  { %v1110_v57 = vsel %vm1108_vm6, %v1107_v55, %v1109_v56 }
 0x391   :  { %v1111_v58 = vpack.c.bf16 %v1110_v57, %v1110_v57 }
 0x393   :  { %1428 = vmatmul.mubr.bf16.vlgmr.msra.gmra.mrb[8].mxu1 %v1111_v58 }
 0x466   :  { %v1217_v62 = vpop.f32.mrb[8].mxu1 }
 0x467   :  { %v1218_v0 = vadd.f32 %v1319_v60, %v1217_v62  ;;  %v1429_v2 = vpop.f32.mrb[9].mxu1 }
 0x468   :  { %v1220_v5 = vpop.f32.mrb[10].mxu1 }
 0x469   :  { %v1328_v6 = vmul.f32 -1.442695, %v1218_v0  ;;  %v1430_v7 = vpop.f32.mrb[11].mxu1 }
 0x46b   :  { %1552 = vpow2.f32 %v1328_v6 }
 0x475   :  { %v1553_v59 = vpop.eup %1552 }
 0x476   :  { %v1226_v63 = vadd.f32 1.0, %v1553_v59 }
 0x478   :  { %1554 = vrcp.f32 %v1226_v63 }
 0x482   :  { %v1555_v43 = vpop.eup %1554 }
 0x483   :  { %1229 = vst [vmem:[#allocation10] sm:$0xff] %v1555_v43 }
 0x484   :  { %1655 = shalt.err (!%p1652_p8)
}
 0x485   :  { %s1656_s22 = scalar_lea.hbm %s1918_s12, 128 }
 0x486   :  { %p1657_p9 = scmp.ne.s32.totalorder %s1918_s12, %s1656_s22  ;;  %p1660_p10 = scmp.lt.u32.totalorder %s1656_s22, %s1918_s12 }
 0x488   :  { %p1662_p11 = pnand %p1660_p10, %p1657_p9 }
 0x48a   :  { %1665 = shalt.err (!%p1662_p11)
}
 0x48b   :  { %1239 = dma.vmem_to_hbm [thread:$0]  %s1237_s18, 128, %s1918_s12, [#allocation4]  }
 0x48c   :  { %1672 = dma.done.wait [#allocation4], 128  }
 0x48d   :  { %1673 = vsyncadd [#allocation4], 4294967168 }
 0x48e   :  { %1243 = vsyncpa [#allocation3], 1 }
 0x48f   :  { %1244 = vsyncpa [#allocation6], 1 }
 0x490   :  { %1245 = vsyncpa [#allocation9], 1 }
 0x491   :  { %1246 = vsyncpa [#allocation4], 1 }

</bundles_post_ra>
